<compile_context>
chip_gen: v6e
topology: v6e:2x2x1
jax: 0.10.0
libtpu: 0.0.40
codegen_flags: <defaults>
</compile_context>

<pallas_src>
import functools

import jax
import jax.numpy as jnp
from jax.experimental import pallas as pl
from jax.experimental.pallas import tpu as pltpu


def _round_up(x, m):
    return ((x + m - 1) // m) * m


def _physical_vmem_bytes():
    """Best-effort query of per-core VMEM; conservative (v7x-sized) fallback."""
    try:
        info = pltpu.get_tpu_info()
        v = getattr(info, "vmem_capacity_bytes", None)
        if v:
            return int(v)
    except Exception:
        pass
    return 64 * 1024 * 1024


def _vmem_bytes(tm, ti, D, I, wbytes, xbytes, obytes):
    """Estimate of VMEM needed for one grid step (incl. double buffers & h)."""
    return int(
        2 * tm * D * xbytes            # x tile, double-buffered
        + 2 * tm * D * obytes          # out tile, double-buffered
        + 2 * 2 * D * ti * wbytes      # w1 + w2 chunks, double-buffered
        + tm * D * wbytes              # cached LayerNorm output (compute dtype)
        + tm * D * 4                   # f32 output accumulator
        + tm * ti * (4 + wbytes)       # h intermediate (f32) + cast for 2nd dot
        + 2 * tm * D * 4               # LayerNorm / epilogue f32 temporaries
        + (3 * D + I + 2 * ti) * 4 * 2 # gamma/beta/b2/b1 chunks (small)
    )


def _select_tiles(N_sub, D, I, wbytes, xbytes, obytes, sub, vmem_budget):
    """Pick (tm, ti, N_pad): biggest row tile that fits VMEM, bounded padding."""
    # ti candidates: divisors of I that are multiples of 128, largest first.
    ti_cands = [t for t in range(min(I, 2048), 0, -128) if I % t == 0]
    if not ti_cands:
        ti_cands = [I]

    # tm candidates: prefer 256-multiples (256x256 MXU); include "exact N" for
    # small/awkward N so padding waste stays bounded.
    tm_cands = sorted({c for c in (1024, 768, 512, 384, 256, min(N_sub, 1024))
                       if 0 < c <= N_sub}, reverse=True)
    if not tm_cands:
        tm_cands = [N_sub]

    best = None
    for tm in tm_cands:
        for ti in ti_cands:
            if _vmem_bytes(tm, ti, D, I, wbytes, xbytes, obytes) > vmem_budget:
                continue
            n_pad = _round_up(N_sub, tm)
            waste = (n_pad - N_sub) / N_sub
            key = (waste > 0.125,                 # bounded padding first
                   0 if tm % 256 == 0 else 1,     # then MXU-friendly tm
                   -tm, -ti)                      # then biggest tiles
            if best is None or key < best[1]:
                best = ((tm, ti, n_pad), key)
            break  # largest fitting ti for this tm; move to next tm
    if best is None:  # nothing fit the budget: smallest tiles, let it pipeline
        tm, ti = tm_cands[-1], ti_cands[-1]
        best = ((tm, ti, _round_up(N_sub, tm)), None)

    tm, ti, n_pad = best[0]

    # Megacore (v7x has 2 TensorCores): make sure the "parallel" row axis has
    # at least 2 tiles when there is enough work to split.
    if n_pad // tm == 1 and N_sub >= 512:
        tm = _round_up((N_sub + 1) // 2, sub)
        n_pad = 2 * tm
    return tm, ti, n_pad


def ffn_kernel(x_ref, gamma_ref, beta_ref, w1_ref, b1_ref, w2_ref, b2_ref,
               o_ref, xn_ref, acc_ref, *, eps):
    # grid = (row tiles [parallel], intermediate-dim chunks [arbitrary])
    j = pl.program_id(1)

    # --- LayerNorm: once per row tile, cached for all j chunks ---
    @pl.when(j == 0)
    def _():
        x = x_ref[...].astype(jnp.float32)
        mean = jnp.mean(x, axis=-1, keepdims=True)
        centered = x - mean
        var = jnp.mean(centered * centered, axis=-1, keepdims=True)
        xn = centered * jax.lax.rsqrt(var + eps)
        xn = xn * gamma_ref[...] + beta_ref[...]
        xn_ref[...] = xn.astype(xn_ref.dtype)        # stored in compute dtype
        acc_ref[...] = jnp.zeros_like(acc_ref)

    # --- intermediate_dense chunk (native-dtype MXU, f32 accumulate) + SiLU ---
    h = jnp.dot(xn_ref[...], w1_ref[...], preferred_element_type=jnp.float32)
    h = h + b1_ref[...]
    h = h * jax.nn.sigmoid(h)                        # SiLU (sigmoid -> EUP slot)
    # intermediate_dropout: identity at inference
    # TODO(synk): training-mode dropout not implemented.

    # --- output_dense chunk, accumulated over the I axis in f32 ---
    acc_ref[...] += jnp.dot(h.astype(w2_ref.dtype), w2_ref[...],
                            preferred_element_type=jnp.float32)

    @pl.when(j == pl.num_programs(1) - 1)
    def _():
        o_ref[...] = (acc_ref[...] + b2_ref[...]).astype(o_ref.dtype)
        # output_dropout: identity at inference


def feed_forward(hidden_states, params, *, eps=1e-5, compute_dtype=None):
    """hidden_states: (B, L, D) -> (B, L, D).

    compute_dtype: dtype used for the MXU operands (weights + cached LN
    output). None (default) = bf16 when weights are float32, else the weight
    dtype. Accumulation is always f32.
    """
    B, L, D = hidden_states.shape
    I = params["w1"].shape[1]
    assert D % 128 == 0, "hidden_size must be a multiple of 128 (lane-dense tiles)"
    assert I % 128 == 0, "intermediate_size must be a multiple of 128"

    if compute_dtype is None:
        wdt = params["w1"].dtype
        compute_dtype = jnp.bfloat16 if wdt == jnp.dtype(jnp.float32) else wdt
    compute_dtype = jnp.dtype(compute_dtype)

    x_dtype = jnp.dtype(hidden_states.dtype)
    o_dtype = x_dtype
    wbytes = compute_dtype.itemsize
    xbytes = x_dtype.itemsize
    obytes = o_dtype.itemsize

    # sublane packing multiple: 8 rows/vreg for 32-bit, 16 for 16-bit, 32 for 8-bit
    sub = max(8, 32 // min(wbytes, xbytes, obytes))

    N = B * L
    N_sub = _round_up(N, sub)

    # Generation-aware VMEM budget: ~100 MiB on 128 MiB parts (v5e/v6e),
    # ~52 MiB on 64 MiB parts (v7x).
    phys_vmem = _physical_vmem_bytes()
    if phys_vmem >= 128 * 1024 * 1024:
        vmem_cap = 100 * 1024 * 1024
    else:
        vmem_cap = min(52 * 1024 * 1024, int(phys_vmem * 0.8))

    tm, ti, N_pad = _select_tiles(N_sub, D, I, wbytes, xbytes, obytes, sub,
                                  int(vmem_cap * 0.9))

    x2d = hidden_states.reshape(N, D)
    if N_pad != N:
        x2d = jnp.pad(x2d, ((0, N_pad - N), (0, 0)))

    gamma = params["gamma"].reshape(1, D).astype(jnp.float32)
    beta = params["beta"].reshape(1, D).astype(jnp.float32)
    w1 = params["w1"].astype(compute_dtype)                 # (D, I)
    b1 = params["b1"].reshape(1, I).astype(jnp.float32)
    w2 = params["w2"].astype(compute_dtype)                 # (I, D)
    b2 = params["b2"].reshape(1, D).astype(jnp.float32)

    grid = (N_pad // tm, I // ti)

    vmem_est = _vmem_bytes(tm, ti, D, I, wbytes, xbytes, obytes)
    vmem_limit = int(min(max(int(1.4 * vmem_est), 32 * 1024 * 1024), vmem_cap))

    flops = 2 * 2 * N_pad * D * I                           # two matmuls
    bytes_accessed = int(N_pad * D * (xbytes + obytes)
                         + grid[0] * (w1.size + w2.size) * wbytes)
    cost = pl.CostEstimate(flops=flops,
                           transcendentals=N_pad * I,
                           bytes_accessed=bytes_accessed)

    out2d = pl.pallas_call(
        functools.partial(ffn_kernel, eps=eps),
        out_shape=jax.ShapeDtypeStruct((N_pad, D), o_dtype),
        grid_spec=pltpu.PrefetchScalarGridSpec(
            num_scalar_prefetch=0,
            grid=grid,
            in_specs=[
                pl.BlockSpec((tm, D), lambda i, j: (i, 0)),   # x rows
                pl.BlockSpec((1, D), lambda i, j: (0, 0)),    # gamma (resident)
                pl.BlockSpec((1, D), lambda i, j: (0, 0)),    # beta  (resident)
                pl.BlockSpec((D, ti), lambda i, j: (0, j)),   # w1 chunk
                pl.BlockSpec((1, ti), lambda i, j: (0, j)),   # b1 chunk
                pl.BlockSpec((ti, D), lambda i, j: (j, 0)),   # w2 chunk
                pl.BlockSpec((1, D), lambda i, j: (0, 0)),    # b2 (resident)
            ],
            out_specs=pl.BlockSpec((tm, D), lambda i, j: (i, 0)),
            scratch_shapes=[
                pltpu.VMEM((tm, D), compute_dtype),   # cached LayerNorm output
                pltpu.VMEM((tm, D), jnp.float32),     # f32 output accumulator
            ],
        ),
        compiler_params=pltpu.CompilerParams(
            dimension_semantics=("parallel", "arbitrary"),
            vmem_limit_bytes=vmem_limit),
        cost_estimate=cost,
    )(x2d, gamma, beta, w1, b1, w2, b2)

    if N_pad != N:
        out2d = out2d[:N]
    return out2d.reshape(B, L, D)


def init_params(key, hidden_size, intermediate_size, dtype=jnp.float32):
    k1, k2, k3, k4 = jax.random.split(key, 4)
    lim1 = 1.0 / (hidden_size ** 0.5)
    lim2 = 1.0 / (intermediate_size ** 0.5)
    return {
        "gamma": jnp.ones((hidden_size,), dtype),
        "beta": jnp.zeros((hidden_size,), dtype),
        # stored transposed vs torch nn.Linear (we compute x @ W)
        "w1": jax.random.uniform(k1, (hidden_size, intermediate_size), dtype,
                                 minval=-lim1, maxval=lim1),
        "b1": jax.random.uniform(k2, (intermediate_size,), dtype,
                                 minval=-lim1, maxval=lim1),
        "w2": jax.random.uniform(k3, (intermediate_size, hidden_size), dtype,
                                 minval=-lim2, maxval=lim2),
        "b2": jax.random.uniform(k4, (hidden_size,), dtype,
                                 minval=-lim2, maxval=lim2),
    }


def feed_forward_ref(x, params, eps=1e-5):
    xf = x.astype(jnp.float32)
    mean = jnp.mean(xf, axis=-1, keepdims=True)
    var = jnp.mean((xf - mean) ** 2, axis=-1, keepdims=True)
    xn = (xf - mean) * jax.lax.rsqrt(var + eps)
    xn = xn * params["gamma"].astype(jnp.float32) + params["beta"].astype(jnp.float32)
    h = xn @ params["w1"].astype(jnp.float32) + params["b1"].astype(jnp.float32)
    h = h * jax.nn.sigmoid(h)
    out = h @ params["w2"].astype(jnp.float32) + params["b2"].astype(jnp.float32)
    return out.astype(x.dtype)


if __name__ == "__main__":
    # small but TPU-friendly shapes: batch=2, seq=8, hidden=128, intermediate=256
    B, L, D, I = 2, 8, 128, 256
    key = jax.random.PRNGKey(0)
    kx, kp = jax.random.split(key)

    x = jax.random.normal(kx, (B, L, D), jnp.float32)
    params = init_params(kp, D, I)

    ref = feed_forward_ref(x, params)

    # Exact-precision path: weights kept in f32.
    out_f32 = jax.block_until_ready(feed_forward(x, params, compute_dtype=jnp.float32))
    assert out_f32.shape == (B, L, D)
    assert jnp.allclose(out_f32, ref, atol=1e-4, rtol=1e-4), "f32 path mismatch vs reference"

    # Default (performance) path: f32 weights fed to the MXU in bf16
    # (dtype-aware tolerance: bf16 quantization of xn/w1/w2, f32 accumulation).
    out_fast = jax.block_until_ready(feed_forward(x, params))
    assert out_fast.shape == (B, L, D)
    assert jnp.allclose(out_fast, ref, atol=3e-2, rtol=3e-2), "bf16 path mismatch vs reference"

    print("KERNEL_OK")
</pallas_src>

<mosaic_0001>
module attributes {stable_mosaic.version = 11 : i64} {
  func.func @ffn_kernel(%arg0: i32, %arg1: i32, %arg2: memref<16x128xf32, #tpu.memory_space<vmem>>, %arg3: memref<1x128xf32, #tpu.memory_space<vmem>>, %arg4: memref<1x128xf32, #tpu.memory_space<vmem>>, %arg5: memref<128x256xf32, #tpu.memory_space<vmem>>, %arg6: memref<1x256xf32, #tpu.memory_space<vmem>>, %arg7: memref<256x128xf32, #tpu.memory_space<vmem>>, %arg8: memref<1x128xf32, #tpu.memory_space<vmem>>, %arg9: memref<16x128xf32, #tpu.memory_space<vmem>>, %arg10: memref<16x128xf32, #tpu.memory_space<vmem>>, %arg11: memref<16x128xf32, #tpu.memory_space<vmem>>) attributes {dimension_semantics = [#tpu.dimension_semantics<parallel>, #tpu.dimension_semantics<arbitrary>], iteration_bounds = array<i64: 1, 1>, scalar_prefetch = 0 : i64, scratch_operands = 2 : i64, tpu.core_type = #tpu.core_type<tc>, window_params = [{transform_indices = @transform_0, window_bounds = array<i64: 16, 128>}, {pipeline_mode = #tpu.pipeline_mode<synchronous>, transform_indices = @transform_1, window_bounds = array<i64: 1, 128>}, {pipeline_mode = #tpu.pipeline_mode<synchronous>, transform_indices = @transform_2, window_bounds = array<i64: 1, 128>}, {transform_indices = @transform_3, window_bounds = array<i64: 128, 256>}, {transform_indices = @transform_4, window_bounds = array<i64: 1, 256>}, {transform_indices = @transform_5, window_bounds = array<i64: 256, 128>}, {pipeline_mode = #tpu.pipeline_mode<synchronous>, transform_indices = @transform_6, window_bounds = array<i64: 1, 128>}, {transform_indices = @transform_7, window_bounds = array<i64: 16, 128>}]} {
    %c0_i32 = arith.constant 0 : i32
    %0 = arith.cmpi eq, %arg1, %c0_i32 : i32
    %1 = arith.extui %0 : i1 to i32
    %c0_i32_0 = arith.constant 0 : i32
    %2 = arith.cmpi ne, %1, %c0_i32_0 : i32
    scf.if %2 {
      %c0_16 = arith.constant 0 : index
      %c0_17 = arith.constant 0 : index
      %23 = vector.load %arg2[%c0_16, %c0_17] : memref<16x128xf32, #tpu.memory_space<vmem>>, vector<16x128xf32>
      %cst_18 = arith.constant dense<0.000000e+00> : vector<16xf32>
      %24 = vector.multi_reduction <add>, %23, %cst_18 [1] : vector<16x128xf32> to vector<16xf32>
      %25 = vector.shape_cast %24 : vector<16xf32> to vector<16x1xf32>
      %cst_19 = arith.constant 1.280000e+02 : f32
      %26 = vector.broadcast %cst_19 : f32 to vector<16x1xf32>
      %27 = arith.divf %25, %26 : vector<16x1xf32>
      %28 = vector.broadcast %27 : vector<16x1xf32> to vector<16x128xf32>
      %29 = arith.subf %23, %28 : vector<16x128xf32>
      %30 = arith.mulf %29, %29 : vector<16x128xf32>
      %cst_20 = arith.constant dense<0.000000e+00> : vector<16xf32>
      %31 = vector.multi_reduction <add>, %30, %cst_20 [1] : vector<16x128xf32> to vector<16xf32>
      %32 = vector.shape_cast %31 : vector<16xf32> to vector<16x1xf32>
      %cst_21 = arith.constant 1.280000e+02 : f32
      %33 = vector.broadcast %cst_21 : f32 to vector<16x1xf32>
      %34 = arith.divf %32, %33 : vector<16x1xf32>
      %cst_22 = arith.constant 9.99999974E-6 : f32
      %35 = vector.broadcast %cst_22 : f32 to vector<16x1xf32>
      %36 = arith.addf %34, %35 : vector<16x1xf32>
      %37 = math.rsqrt %36 : vector<16x1xf32>
      %38 = vector.broadcast %37 : vector<16x1xf32> to vector<16x128xf32>
      %39 = arith.mulf %29, %38 : vector<16x128xf32>
      %c0_23 = arith.constant 0 : index
      %c0_24 = arith.constant 0 : index
      %40 = vector.load %arg3[%c0_23, %c0_24] : memref<1x128xf32, #tpu.memory_space<vmem>>, vector<1x128xf32>
      %41 = vector.broadcast %40 : vector<1x128xf32> to vector<16x128xf32>
      %42 = arith.mulf %39, %41 : vector<16x128xf32>
      %c0_25 = arith.constant 0 : index
      %c0_26 = arith.constant 0 : index
      %43 = vector.load %arg4[%c0_25, %c0_26] : memref<1x128xf32, #tpu.memory_space<vmem>>, vector<1x128xf32>
      %44 = vector.broadcast %43 : vector<1x128xf32> to vector<16x128xf32>
      %45 = arith.addf %42, %44 : vector<16x128xf32>
      %c0_27 = arith.constant 0 : index
      %c0_28 = arith.constant 0 : index
      %46 = vector.load %arg10[%c0_27, %c0_28] : memref<16x128xf32, #tpu.memory_space<vmem>>, vector<16x128xf32>
      tpu.vector_store %arg10[%c0_27, %c0_28], %45 {strides = array<i32>} : memref<16x128xf32, #tpu.memory_space<vmem>>, vector<16x128xf32>,
      %cst_29 = arith.constant 0.000000e+00 : f32
      %47 = vector.broadcast %cst_29 : f32 to vector<16x128xf32>
      %c0_30 = arith.constant 0 : index
      %c0_31 = arith.constant 0 : index
      %48 = vector.load %arg11[%c0_30, %c0_31] : memref<16x128xf32, #tpu.memory_space<vmem>>, vector<16x128xf32>
      tpu.vector_store %arg11[%c0_30, %c0_31], %47 {strides = array<i32>} : memref<16x128xf32, #tpu.memory_space<vmem>>, vector<16x128xf32>,
    } else {
    }
    %c0 = arith.constant 0 : index
    %c0_1 = arith.constant 0 : index
    %3 = vector.load %arg10[%c0, %c0_1] : memref<16x128xf32, #tpu.memory_space<vmem>>, vector<16x128xf32>
    %c0_2 = arith.constant 0 : index
    %c0_3 = arith.constant 0 : index
    %4 = vector.load %arg5[%c0_2, %c0_3] : memref<128x256xf32, #tpu.memory_space<vmem>>, vector<128x256xf32>
    %cst = arith.constant dense<0.000000e+00> : vector<16x256xf32>
    %5 = tpu.matmul %3, %4, %cst {dimension_numbers = #tpu.dot_dimension_numbers<[1], [0], [0], [1], [0, 0, 1, 1], [], []>} : vector<16x128xf32>, vector<128x256xf32>, vector<16x256xf32> -> vector<16x256xf32>
    %c0_4 = arith.constant 0 : index
    %c0_5 = arith.constant 0 : index
    %6 = vector.load %arg6[%c0_4, %c0_5] : memref<1x256xf32, #tpu.memory_space<vmem>>, vector<1x256xf32>
    %7 = vector.broadcast %6 : vector<1x256xf32> to vector<16x256xf32>
    %8 = arith.addf %5, %7 : vector<16x256xf32>
    %9 = arith.negf %8 : vector<16x256xf32>
    %10 = math.exp %9 : vector<16x256xf32>
    %cst_6 = arith.constant 1.000000e+00 : f32
    %11 = vector.broadcast %cst_6 : f32 to vector<16x256xf32>
    %12 = arith.addf %11, %10 : vector<16x256xf32>
    %13 = arith.divf %11, %12 : vector<16x256xf32>
    %14 = arith.mulf %8, %13 : vector<16x256xf32>
    %c0_7 = arith.constant 0 : index
    %c0_8 = arith.constant 0 : index
    %15 = vector.load %arg11[%c0_7, %c0_8] : memref<16x128xf32, #tpu.memory_space<vmem>>, vector<16x128xf32>
    %c0_9 = arith.constant 0 : index
    %c0_10 = arith.constant 0 : index
    %16 = vector.load %arg7[%c0_9, %c0_10] : memref<256x128xf32, #tpu.memory_space<vmem>>, vector<256x128xf32>
    %cst_11 = arith.constant dense<0.000000e+00> : vector<16x128xf32>
    %17 = tpu.matmul %14, %16, %cst_11 {dimension_numbers = #tpu.dot_dimension_numbers<[1], [0], [0], [1], [0, 0, 1, 1], [], []>} : vector<16x256xf32>, vector<256x128xf32>, vector<16x128xf32> -> vector<16x128xf32>
    %18 = arith.addf %15, %17 : vector<16x128xf32>
    %c0_12 = arith.constant 0 : index
    %c0_13 = arith.constant 0 : index
    %19 = vector.load %arg11[%c0_12, %c0_13] : memref<16x128xf32, #tpu.memory_space<vmem>>, vector<16x128xf32>
    tpu.vector_store %arg11[%c0_12, %c0_13], %18 {strides = array<i32>} : memref<16x128xf32, #tpu.memory_space<vmem>>, vector<16x128xf32>,
    %c0_i32_14 = arith.constant 0 : i32
    %20 = arith.cmpi eq, %arg1, %c0_i32_14 : i32
    %21 = arith.extui %20 : i1 to i32
    %c0_i32_15 = arith.constant 0 : i32
    %22 = arith.cmpi ne, %21, %c0_i32_15 : i32
    scf.if %22 {
      %c0_16 = arith.constant 0 : index
      %c0_17 = arith.constant 0 : index
      %23 = vector.load %arg11[%c0_16, %c0_17] : memref<16x128xf32, #tpu.memory_space<vmem>>, vector<16x128xf32>
      %c0_18 = arith.constant 0 : index
      %c0_19 = arith.constant 0 : index
      %24 = vector.load %arg8[%c0_18, %c0_19] : memref<1x128xf32, #tpu.memory_space<vmem>>, vector<1x128xf32>
      %25 = vector.broadcast %24 : vector<1x128xf32> to vector<16x128xf32>
      %26 = arith.addf %23, %25 : vector<16x128xf32>
      %c0_20 = arith.constant 0 : index
      %c0_21 = arith.constant 0 : index
      %27 = vector.load %arg9[%c0_20, %c0_21] : memref<16x128xf32, #tpu.memory_space<vmem>>, vector<16x128xf32>
      tpu.vector_store %arg9[%c0_20, %c0_21], %26 {strides = array<i32>} : memref<16x128xf32, #tpu.memory_space<vmem>>, vector<16x128xf32>,
    } else {
    }
    return
  }
  func.func @transform_0(%arg0: i32, %arg1: i32) -> (i32, i32) {
    %c0_i32 = arith.constant 0 : i32
    %c0_i32_0 = arith.constant 0 : i32
    return %arg0, %c0_i32 : i32, i32
  }
  func.func @transform_1(%arg0: i32, %arg1: i32) -> (i32, i32) {
    %c0_i32 = arith.constant 0 : i32
    %c0_i32_0 = arith.constant 0 : i32
    %c0_i32_1 = arith.constant 0 : i32
    return %c0_i32, %c0_i32_0 : i32, i32
  }
  func.func @transform_2(%arg0: i32, %arg1: i32) -> (i32, i32) {
    %c0_i32 = arith.constant 0 : i32
    %c0_i32_0 = arith.constant 0 : i32
    %c0_i32_1 = arith.constant 0 : i32
    return %c0_i32, %c0_i32_0 : i32, i32
  }
  func.func @transform_3(%arg0: i32, %arg1: i32) -> (i32, i32) {
    %c0_i32 = arith.constant 0 : i32
    %c0_i32_0 = arith.constant 0 : i32
    return %c0_i32, %arg1 : i32, i32
  }
  func.func @transform_4(%arg0: i32, %arg1: i32) -> (i32, i32) {
    %c0_i32 = arith.constant 0 : i32
    %c0_i32_0 = arith.constant 0 : i32
    return %c0_i32, %arg1 : i32, i32
  }
  func.func @transform_5(%arg0: i32, %arg1: i32) -> (i32, i32) {
    %c0_i32 = arith.constant 0 : i32
    %c0_i32_0 = arith.constant 0 : i32
    return %arg1, %c0_i32 : i32, i32
  }
  func.func @transform_6(%arg0: i32, %arg1: i32) -> (i32, i32) {
    %c0_i32 = arith.constant 0 : i32
    %c0_i32_0 = arith.constant 0 : i32
    %c0_i32_1 = arith.constant 0 : i32
    return %c0_i32, %c0_i32_0 : i32, i32
  }
  func.func @transform_7(%arg0: i32, %arg1: i32) -> (i32, i32) {
    %c0_i32 = arith.constant 0 : i32
    %c0_i32_0 = arith.constant 0 : i32
    return %arg0, %c0_i32 : i32, i32
  }
}

</mosaic_0001>

<bundles_post_ra>
// kernel: tpu_custom_call.1
= control target key start
LH: loop header
LB: loop body
LE: loop exit
PB: predicated region body
PF: predicated region fallthrough
CT: control target
= control target key end

     0   :  { %12 = vsyncpa [#allocation5], 0  ;;  %s706_s0 = inlined_call_operand.hbm [shape: f32[16,128], index: 0, kind: input, shape index: {}]   ;;  %s707_s1 = inlined_call_operand.vmem [shape: f32[1,128], index: 1, kind: input, shape index: {}]   ;;  %s708_s2 = inlined_call_operand.hbm [shape: f32[1,128], index: 2, kind: input, shape index: {}]   ;;  %s709_s3 = inlined_call_operand.hbm [shape: f32[128,256], index: 3, kind: input, shape index: {}]   ;;  %s710_s4 = inlined_call_operand.vmem [shape: f32[1,256], index: 4, kind: input, shape index: {}]   ;;  %s711_s5 = inlined_call_operand.hbm [shape: f32[256,128], index: 5, kind: input, shape index: {}]   ;;  %s712_s6 = inlined_call_operand.vmem [shape: f32[1,128], index: 6, kind: input, shape index: {}]   ;;  %s713_s7 = inlined_call_operand.hbm [shape: f32[16,128], index: 7, kind: output, shape index: {}]  }
   0x1   :  { %13 = vsyncpa [#allocation8], 0 }
   0x2   :  { %14 = vsyncpa [#allocation11], 0 }
   0x3   :  { %15 = vsyncpa [#allocation6], 0  ;;  %s613_s24 = smov [#allocation7]   ;;  %s614_s26 = smov [#allocation4]  }
   0x4   :  { %s36_s25 = sshll.u32 %s613_s24, 4  ;;  %s21_s27 = sshll.u32 %s614_s26, 4  ;;  %s37_s25 = int_to_ptr.vmem [resolvable:$true] %s36_s25  ;;  %s22_s27 = int_to_ptr.vmem [resolvable:$true] %s21_s27 }
   0x5   :  { %s513_s28 = scalar_lea.vmem %s37_s25, 16  ;;  %s517_s29 = scalar_lea.vmem %s37_s25, 32 }
   0x6   :  { %p514_p0 = scmp.ne.s32.totalorder %s37_s25, %s513_s28  ;;  %p518_p1 = scmp.lt.s32.totalorder %s37_s25, %s37_s25 }
   0x7   :  { %p519_p2 = scmp.lt.s32.totalorder %s517_s29, %s513_s28 }
   0x9   :  { %p520_p3 = por %p519_p2, %p518_p1 }
   0xb   :  { %p521_p4 = pnand %p520_p3, %p514_p0 }
   0xd   :  { %524 = shalt.err (!%p521_p4)
}
   0xe   :  { %39 = dma.hbm_to_vmem [thread:$0]  %s708_s2, 16, %s37_s25, [#allocation8]  }
   0xf   :  { %s533_s9 = scalar_lea.vmem %s22_s27, 256  ;;  %p538_p6 = scmp.lt.s32.totalorder %s22_s27, %s22_s27 }
  0x10   :  { %p534_p5 = scmp.ne.s32.totalorder %s22_s27, %s533_s9  ;;  %p539_p7 = scmp.lt.s32.totalorder %s533_s9, %s533_s9 }
  0x12   :  { %p540_p8 = por %p539_p7, %p538_p6 }
  0x14   :  { %p541_p9 = pnand %p540_p8, %p534_p5 }
  0x16   :  { %544 = shalt.err (!%p541_p9)
}
  0x17   :  { %s615_s10 = smov 128   ;;  %s616_s11 = smov 8  }
  0x18   :  { %27 = dma.hbm_to_vmem [thread:$0]  %s706_s0, 256, %s22_s27, [#allocation5], %s615_s10, %s615_s10, %s616_s11  }
  0x19   :  { %s617_s14 = smov [#allocation9]  }
  0x1a   :  { %s45_s15 = sshll.u32 %s617_s14, 4  ;;  %s46_s15 = int_to_ptr.vmem [resolvable:$true] %s45_s15 }
  0x1b   :  { %s553_s2 = scalar_lea.vmem %s46_s15, 4096  ;;  %p558_p11 = scmp.lt.s32.totalorder %s46_s15, %s46_s15 }
  0x1c   :  { %p554_p10 = scmp.ne.s32.totalorder %s46_s15, %s553_s2  ;;  %p559_p12 = scmp.lt.s32.totalorder %s553_s2, %s553_s2 }
  0x1e   :  { %p560_p13 = por %p559_p12, %p558_p11 }
  0x20   :  { %p561_p0 = pnand %p560_p13, %p554_p10 }
  0x22   :  { %564 = shalt.err (!%p561_p0)
}
  0x23   :  { %s618_s16 = smov 256   ;;  %s619_s17 = smov 16  }
  0x24   :  { %51 = dma.hbm_to_vmem [thread:$0]  %s709_s3, 4096, %s46_s15, [#allocation8], %s618_s16, %s618_s16, %s619_s17  }
  0x25   :  { %s620_s20 = smov [#allocation10]  }
  0x26   :  { %s59_s21 = sshll.u32 %s620_s20, 4  ;;  %s60_s21 = int_to_ptr.vmem [resolvable:$true] %s59_s21 }
  0x27   :  { %s573_s0 = scalar_lea.vmem %s60_s21, 4096  ;;  %p578_p2 = scmp.lt.s32.totalorder %s60_s21, %s60_s21 }
  0x28   :  { %p574_p1 = scmp.ne.s32.totalorder %s60_s21, %s573_s0  ;;  %p579_p3 = scmp.lt.s32.totalorder %s573_s0, %s573_s0 }
  0x2a   :  { %p580_p4 = por %p579_p3, %p578_p2 }
  0x2c   :  { %p581_p5 = pnand %p580_p4, %p574_p1 }
  0x2e   :  { %584 = shalt.err (!%p581_p5)
}
  0x2f   :  { %65 = dma.hbm_to_vmem [thread:$0]  %s711_s5, 4096, %s60_s21, [#allocation11], %s615_s10, %s615_s10, %s616_s11  }
  0x30   :  { %605 = dma.done.wait [#allocation5], 256  }
  0x31   :  { %606 = vsyncadd [#allocation5], 4294967040 }
  0x32   :  { %607 = dma.done.wait [#allocation8], 4112  }
  0x33   :  { %608 = vsyncadd [#allocation8], 4294963184 }
  0x34   :  { %609 = dma.done.wait [#allocation11], 4096  }
  0x35   :  { %610 = vsyncadd [#allocation11], 4294963200  ;;  %v84_v0 = vld [vmem:[#allocation4] sm:$0xff]  ;;  %v85_v1 = vld [vmem:[#allocation4 + $0x8] sm:$0xff]  ;;  %v621_v31 = vmov 0.0   ;;  %s622_s26 = smov [#allocation12]  }
  0x36   :  { %86 = vadd.xlane.f32.xlu0 %v84_v0  ;;  %v164_v2 = vld [vmem:[#allocation9 + $0xf8] sm:$0xff]  ;;  %v163_v3 = vld [vmem:[#allocation9 + $0xf0] sm:$0xff]  ;;  %v162_v4 = vld [vmem:[#allocation9 + $0xe8] sm:$0xff]  ;;  %241 = vmatprep.mubr.f32.mxu0 %v621_v31  ;;  %s416_s27 = sshll.u32 %s622_s26, 4  ;;  %s417_s27 = int_to_ptr.vmem [resolvable:$true] %s416_s27 }
  0x37   :  { %177 = vmatprep.subr.mxu0 %v164_v2  ;;  %v161_v5 = vld [vmem:[#allocation9 + $0xe0] sm:$0xff]  ;;  %v160_v6 = vld [vmem:[#allocation9 + $0xd8] sm:$0xff]  ;;  %v159_v7 = vld [vmem:[#allocation9 + $0xd0] sm:$0xff]  ;;  %s585_s28 = scalar_lea.vmem %s417_s27, 256  ;;  %p590_p7 = scmp.lt.s32.totalorder %s417_s27, %s417_s27 }
  0x38   :  { %178 = vmatpush1.msra.mxu0 %v163_v3  ;;  %v158_v8 = vld [vmem:[#allocation9 + $0xc8] sm:$0xff]  ;;  %v157_v9 = vld [vmem:[#allocation9 + $0xc0] sm:$0xff]  ;;  %v156_v18 = vld [vmem:[#allocation9 + $0xb8] sm:$0xff]  ;;  %p586_p6 = scmp.ne.s32.totalorder %s417_s27, %s585_s28  ;;  %p591_p8 = scmp.lt.s32.totalorder %s585_s28, %s585_s28 }
  0x39   :  { %179 = vmatprep.subr.mxu0 %v162_v4  ;;  %v155_v19 = vld [vmem:[#allocation9 + $0xb0] sm:$0xff]  ;;  %v154_v20 = vld [vmem:[#allocation9 + $0xa8] sm:$0xff]  ;;  %v153_v21 = vld [vmem:[#allocation9 + $0xa0] sm:$0xff] }
  0x3a   :  { %88 = vadd.xlane.f32.xlu0 %v85_v1  ;;  %180 = vmatpush1.msra.mxu0 %v161_v5  ;;  %v152_v22 = vld [vmem:[#allocation9 + $0x98] sm:$0xff]  ;;  %v151_v23 = vld [vmem:[#allocation9 + $0x90] sm:$0xff]  ;;  %v150_v24 = vld [vmem:[#allocation9 + $0x88] sm:$0xff]  ;;  %p592_p9 = por %p591_p8, %p590_p7 }
  0x3b   :  { %181 = vmatprep.subr.mxu0 %v160_v6  ;;  %v149_v25 = vld [vmem:[#allocation9 + $0x80] sm:$0xff]  ;;  %v148_v26 = vld [vmem:[#allocation9 + $0x78] sm:$0xff]  ;;  %v147_v27 = vld [vmem:[#allocation9 + $0x70] sm:$0xff] }
  0x3c   :  { %182 = vmatpush1.msra.mxu0 %v159_v7  ;;  %v146_v28 = vld [vmem:[#allocation9 + $0x68] sm:$0xff]  ;;  %v145_v29 = vld [vmem:[#allocation9 + $0x60] sm:$0xff]  ;;  %v144_v30 = vld [vmem:[#allocation9 + $0x58] sm:$0xff]  ;;  %p593_p10 = pnand %p592_p9, %p586_p6 }
  0x3d   :  { %183 = vmatprep.subr.mxu0 %v158_v8  ;;  %v143_v32 = vld [vmem:[#allocation9 + $0x50] sm:$0xff]  ;;  %v142_v33 = vld [vmem:[#allocation9 + $0x48] sm:$0xff]  ;;  %v141_v34 = vld [vmem:[#allocation9 + $0x40] sm:$0xff] }
  0x3e   :  { %184 = vmatpush1.msra.mxu0 %v157_v9  ;;  %v140_v35 = vld [vmem:[#allocation9 + $0x38] sm:$0xff]  ;;  %v139_v36 = vld [vmem:[#allocation9 + $0x30] sm:$0xff]  ;;  %v138_v37 = vld [vmem:[#allocation9 + $0x28] sm:$0xff] }
  0x3f   :  { %185 = vmatprep.subr.mxu0 %v156_v18  ;;  %v137_v38 = vld [vmem:[#allocation9 + $0x20] sm:$0xff]  ;;  %v136_v39 = vld [vmem:[#allocation9 + $0x18] sm:$0xff]  ;;  %v135_v40 = vld [vmem:[#allocation9 + $0x10] sm:$0xff] }
  0x40   :  { %186 = vmatpush1.msra.mxu0 %v155_v19  ;;  %v134_v41 = vld [vmem:[#allocation9 + $0x8] sm:$0xff]  ;;  %v133_v42 = vld [vmem:[#allocation9] sm:$0xff]  ;;  %v431_v52 = vld [vmem:[#allocation7] ss:$0 sm:$0xff] }
  0x41   :  { %187 = vmatprep.subr.mxu0 %v154_v20  ;;  %v430_v50 = vld [vmem:[%s707_s1] ss:$0 sm:$0xff]  ;;  %v315_v59 = vld [vmem:[#allocation10 + $0xf8] sm:$0xff]  ;;  %v314_v61 = vld [vmem:[#allocation10 + $0xf0] sm:$0xff] }
  0x42   :  { %188 = vmatpush1.msra.mxu0 %v153_v21  ;;  %437 = vmatprep.subr.mxu1 %v315_v59  ;;  %v299_v60 = vld [vmem:[#allocation10 + $0x78] sm:$0xff]  ;;  %v298_v62 = vld [vmem:[#allocation10 + $0x70] sm:$0xff]  ;;  %v313_v63 = vld [vmem:[#allocation10 + $0xe8] sm:$0xff] }
  0x43   :  { %189 = vmatprep.subr.mxu0 %v152_v22  ;;  %438 = vmatpush3.msra.mxu1 %v299_v60  ;;  %v296_v2 = vld [vmem:[#allocation10 + $0x60] sm:$0xff]  ;;  %v311_v3 = vld [vmem:[#allocation10 + $0xd8] sm:$0xff]  ;;  %v310_v5 = vld [vmem:[#allocation10 + $0xd0] sm:$0xff] }
  0x44   :  { %190 = vmatpush1.msra.mxu0 %v151_v23  ;;  %439 = vmatprep.subr.mxu1 %v314_v61  ;;  %v295_v4 = vld [vmem:[#allocation10 + $0x58] sm:$0xff]  ;;  %v294_v6 = vld [vmem:[#allocation10 + $0x50] sm:$0xff]  ;;  %v309_v7 = vld [vmem:[#allocation10 + $0xc8] sm:$0xff] }
  0x45   :  { %191 = vmatprep.subr.mxu0 %v150_v24  ;;  %440 = vmatpush3.msra.mxu1 %v298_v62  ;;  %v293_v8 = vld [vmem:[#allocation10 + $0x48] sm:$0xff]  ;;  %v308_v9 = vld [vmem:[#allocation10 + $0xc0] sm:$0xff]  ;;  %v303_v19 = vld [vmem:[#allocation10 + $0x98] sm:$0xff] }
  0x46   :  { %192 = vmatpush1.msra.mxu0 %v149_v25  ;;  %441 = vmatprep.subr.mxu1 %v313_v63  ;;  %v288_v18 = vld [vmem:[#allocation10 + $0x20] sm:$0xff]  ;;  %v287_v20 = vld [vmem:[#allocation10 + $0x18] sm:$0xff]  ;;  %v302_v21 = vld [vmem:[#allocation10 + $0x90] sm:$0xff] }
  0x47   :  { %193 = vmatprep.subr.mxu0 %v148_v26  ;;  %v286_v22 = vld [vmem:[#allocation10 + $0x10] sm:$0xff]  ;;  %v301_v23 = vld [vmem:[#allocation10 + $0x88] sm:$0xff]  ;;  %v300_v25 = vld [vmem:[#allocation10 + $0x80] sm:$0xff] }
  0x48   :  { %194 = vmatpush1.msra.mxu0 %v147_v27  ;;  %v285_v24 = vld [vmem:[#allocation10 + $0x8] sm:$0xff]  ;;  %v284_v26 = vld [vmem:[#allocation10] sm:$0xff]  ;;  %v167_v27 = vlaneseq }
  0x49   :  { %195 = vmatprep.subr.mxu0 %v146_v28 }
  0x4a   :  { %196 = vmatpush1.msra.mxu0 %v145_v29  ;;  %v168_v28 = vshrl.u32 %v167_v27, 7 }
  0x4b   :  { %197 = vmatprep.subr.mxu0 %v144_v30  ;;  %v165_v30 = vld [vmem:[%s710_s4] sm:$0x3] }
  0x4c   :  { %198 = vmatpush1.msra.mxu0 %v143_v32  ;;  %v169_v29 = vsub.s32 0, %v168_v28 }
  0x4d   :  { %199 = vmatprep.subr.mxu0 %v142_v33 }
  0x4e   :  { %200 = vmatpush1.msra.mxu0 %v141_v34  ;;  %v170_v32 = vrot.slane %v165_v30, %v169_v29 }
  0x4f   :  { %201 = vmatprep.subr.mxu0 %v140_v35 }
  0x50   :  { %202 = vmatpush1.msra.mxu0 %v139_v36 }
  0x51   :  { %203 = vmatprep.subr.mxu0 %v138_v37 }
  0x52   :  { %204 = vmatpush1.msra.mxu0 %v137_v38 }
  0x53   :  { %205 = vmatprep.subr.mxu0 %v136_v39 }
  0x54   :  { %206 = vmatpush1.msra.mxu0 %v135_v40 }
  0x55   :  { %207 = vmatprep.subr.mxu0 %v134_v41 }
  0x56   :  { %208 = vmatpush1.msra.mxu0 %v133_v42 }
  0xbf   :  { %v87_v10 = vpop.xlane.xlu0 %86 }
  0xc0   :  { %v91_v11 = vmul.f32 0.0078125, %v87_v10  ;;  %v292_v10 = vld [vmem:[#allocation10 + $0x40] sm:$0xff] }
  0xc2   :  { %v681_v12 = vsub.f32 %v84_v0, %v91_v11  ;;  %v297_v0 = vld [vmem:[#allocation10 + $0x68] sm:$0xff]  ;;  %v307_v11 = vld [vmem:[#allocation10 + $0xb8] sm:$0xff] }
  0xc3   :  { %v89_v13 = vpop.xlane.xlu0 %88  ;;  %442 = vmatpush3.msra.mxu1 %v297_v0  ;;  %v436_v0 = vld [vmem:[%s712_s6] ss:$0 sm:$0xff] }
  0xc4   :  { %v92_v14 = vmul.f32 0.0078125, %v89_v13  ;;  %v95_v15 = vmul.f32 %v681_v12, %v681_v12  ;;  %v306_v13 = vld [vmem:[#allocation10 + $0xb0] sm:$0xff] }
  0xc6   :  { %v685_v16 = vsub.f32 %v85_v1, %v92_v14  ;;  %97 = vadd.xlane.f32.xlu1 %v95_v15  ;;  %v312_v1 = vld [vmem:[#allocation10 + $0xe0] sm:$0xff]  ;;  %v290_v14 = vld [vmem:[#allocation10 + $0x30] sm:$0xff]  ;;  %v305_v15 = vld [vmem:[#allocation10 + $0xa8] sm:$0xff] }
  0xc7   :  { %443 = vmatprep.subr.mxu1 %v312_v1 }
  0xc8   :  { %v96_v17 = vmul.f32 %v685_v16, %v685_v16  ;;  %444 = vmatpush3.msra.mxu1 %v296_v2 }
  0xc9   :  { %445 = vmatprep.subr.mxu1 %v311_v3 }
  0xca   :  { %99 = vadd.xlane.f32.xlu1 %v96_v17  ;;  %446 = vmatpush3.msra.mxu1 %v295_v4  ;;  %v304_v17 = vld [vmem:[#allocation10 + $0xa0] sm:$0xff] }
  0xcb   :  { %447 = vmatprep.subr.mxu1 %v310_v5 }
  0xcc   :  { %448 = vmatpush3.msra.mxu1 %v294_v6 }
  0xcd   :  { %449 = vmatprep.subr.mxu1 %v309_v7 }
  0xce   :  { %450 = vmatpush3.msra.mxu1 %v293_v8 }
  0xcf   :  { %451 = vmatprep.subr.mxu1 %v308_v9 }
  0xd0   :  { %452 = vmatpush3.msra.mxu1 %v292_v10 }
  0xd1   :  { %453 = vmatprep.subr.mxu1 %v307_v11 }
 0x14f   :  { %v98_v43 = vpop.xlane.xlu1 %97 }
 0x150   :  { %v101_v44 = vmul.f32 0.0078125, %v98_v43 }
 0x152   :  { %v103_v45 = vadd.f32 1e-05, %v101_v44 }
 0x153   :  { %v100_v46 = vpop.xlane.xlu1 %99 }
 0x154   :  { %485 = vrsqrt.f32 %v103_v45  ;;  %v102_v47 = vmul.f32 0.0078125, %v100_v46 }
 0x156   :  { %v104_v48 = vadd.f32 1e-05, %v102_v47 }
 0x158   :  { %487 = vrsqrt.f32 %v104_v48 }
 0x161   :  { %v486_v49 = vpop.eup %485 }
 0x162   :  { %v107_v51 = vmul.f32 %v486_v49, %v681_v12  ;;  %v291_v12 = vld [vmem:[#allocation10 + $0x38] sm:$0xff] }
 0x163   :  { %454 = vmatpush3.msra.mxu1 %v291_v12 }
 0x164   :  { %v116_v53 = vmul.f32 %v430_v50, %v107_v51  ;;  %455 = vmatprep.subr.mxu1 %v306_v13 }
 0x165   :  { %v488_v54 = vpop.eup %487  ;;  %456 = vmatpush3.msra.mxu1 %v290_v14 }
 0x166   :  { %v125_v55 = vadd.f32 %v431_v52, %v116_v53  ;;  %v108_v56 = vmul.f32 %v488_v54, %v685_v16  ;;  %457 = vmatprep.subr.mxu1 %v305_v15  ;;  %v289_v16 = vld [vmem:[#allocation10 + $0x28] sm:$0xff] }
 0x167   :  { %458 = vmatpush3.msra.mxu1 %v289_v16 }
 0x168   :  { %242 = vmatmul.mubr.f32.vlgmr.msra.gmra.mxu0 %v125_v55  ;;  %v117_v57 = vmul.f32 %v430_v50, %v108_v56  ;;  %459 = vmatprep.subr.mxu1 %v304_v17 }
 0x169   :  { %247 = vmatprep.mubr.f32.mxu0 %v621_v31  ;;  %460 = vmatpush3.msra.mxu1 %v288_v18  ;;  %v173_v31 = vsub.s32 1, %v168_v28 }
 0x16a   :  { %v126_v58 = vadd.f32 %v431_v52, %v117_v57  ;;  %461 = vmatprep.subr.mxu1 %v303_v19 }
 0x16b   :  { %462 = vmatpush3.msra.mxu1 %v287_v20  ;;  %v174_v33 = vrot.slane %v165_v30, %v173_v31 }
 0x16c   :  { %248 = vmatmul.mubr.f32.gmra.mxu0 %v126_v58  ;;  %463 = vmatprep.subr.mxu1 %v302_v21 }
 0x16d   :  { %464 = vmatpush3.msra.mxu1 %v286_v22 }
 0x16e   :  { %465 = vmatprep.subr.mxu1 %v301_v23 }
 0x16f   :  { %466 = vmatpush3.msra.mxu1 %v285_v24 }
 0x170   :  { %467 = vmatprep.subr.mxu1 %v300_v25 }
 0x171   :  { %468 = vmatpush3.msra.mxu1 %v284_v26 }
 0x228   :  { %v243_v34 = vpop.f32.mrf.mxu0 }
 0x229   :  { %v244_v35 = vadd.f32 %v243_v34, %v170_v32 }
 0x22a   :  { %v245_v36 = vpop.f32.mrf.mxu0 }
 0x22b   :  { %v432_v37 = vmul.f32 -1.442695, %v244_v35  ;;  %v246_v38 = vadd.f32 %v245_v36, %v174_v33 }
 0x22c   :  { %v249_v39 = vpop.f32.mrf.mxu0 }
 0x22d   :  { %489 = vpow2.f32 %v432_v37  ;;  %v433_v40 = vmul.f32 -1.442695, %v246_v38  ;;  %v250_v41 = vadd.f32 %v249_v39, %v170_v32 }
 0x22e   :  { %v251_v42 = vpop.f32.mrf.mxu0 }
 0x22f   :  { %491 = vpow2.f32 %v433_v40  ;;  %v434_v43 = vmul.f32 -1.442695, %v250_v41  ;;  %v252_v44 = vadd.f32 %v251_v42, %v174_v33 }
 0x231   :  { %493 = vpow2.f32 %v434_v43  ;;  %v435_v45 = vmul.f32 -1.442695, %v252_v44 }
 0x233   :  { %495 = vpow2.f32 %v435_v45 }
 0x23a   :  { %v490_v46 = vpop.eup %489 }
 0x23b   :  { %v266_v47 = vadd.f32 1.0, %v490_v46 }
 0x23c   :  { %v492_v48 = vpop.eup %491 }
 0x23d   :  { %v267_v49 = vadd.f32 1.0, %v492_v48  ;;  %497 = vrcp.f32 %v266_v47 }
 0x23e   :  { %v494_v50 = vpop.eup %493 }
 0x23f   :  { %499 = vrcp.f32 %v267_v49  ;;  %v268_v51 = vadd.f32 1.0, %v494_v50 }
 0x240   :  { %v496_v52 = vpop.eup %495 }
 0x241   :  { %v269_v53 = vadd.f32 1.0, %v496_v52  ;;  %501 = vrcp.f32 %v268_v51 }
 0x243   :  { %503 = vrcp.f32 %v269_v53 }
 0x24a   :  { %v498_v54 = vpop.eup %497 }
 0x24b   :  { %v278_v57 = vmul.f32 %v498_v54, %v244_v35 }
 0x24c   :  { %v500_v55 = vpop.eup %499 }
 0x24d   :  { %v279_v56 = vmul.f32 %v500_v55, %v246_v38 }
 0x24e   :  { %v502_v58 = vpop.eup %501 }
 0x24f   :  { %380 = vmatprep.mubr.f32.mxu1 %v279_v56  ;;  %v280_v61 = vmul.f32 %v502_v58, %v250_v41 }
 0x250   :  { %v504_v59 = vpop.eup %503  ;;  %381 = vmatmul.mubr.f32.vlgmr.msra.gmra.mxu1 %v278_v57 }
 0x251   :  { %v281_v60 = vmul.f32 %v504_v59, %v252_v44 }
 0x253   :  { %385 = vmatprep.mubr.f32.mxu1 %v281_v60 }
 0x254   :  { %386 = vmatmul.mubr.f32.gmra.mxu1 %v280_v61 }
 0x310   :  { %v469_v62 = vpop.f32.mrf.mxu1 }
 0x312   :  { %v470_v63 = vpop.f32.mrf.mxu1 }
 0x313   :  { %v471_v1 = vadd.f32 %v470_v63, %v469_v62 }
 0x314   :  { %v472_v2 = vpop.f32.mrf.mxu1 }
 0x315   :  { %v407_v3 = vadd.f32 %v471_v1, %v436_v0 }
 0x316   :  { %v473_v4 = vpop.f32.mrf.mxu1 }
 0x317   :  { %409 = vst [vmem:[#allocation12] sm:$0xff] %v407_v3  ;;  %v474_v5 = vadd.f32 %v473_v4, %v472_v2 }
 0x319   :  { %v408_v6 = vadd.f32 %v474_v5, %v436_v0 }
 0x31b   :  { %410 = vst [vmem:[#allocation12 + $0x8] sm:$0xff] %v408_v6 }
 0x31c   :  { %596 = shalt.err (!%p593_p10)
}
 0x31d   :  { %422 = dma.vmem_to_hbm [thread:$0]  %s417_s27, 256, %s713_s7, [#allocation6], %s615_s10, %s615_s10, %s616_s11  }
 0x31e   :  { %611 = dma.done.wait [#allocation6], 256  }
 0x31f   :  { %612 = vsyncadd [#allocation6], 4294967040 }
 0x320   :  { %426 = vsyncpa [#allocation5], 1 }
 0x321   :  { %427 = vsyncpa [#allocation8], 1 }
 0x322   :  { %428 = vsyncpa [#allocation11], 1 }
 0x323   :  { %429 = vsyncpa [#allocation6], 1 }

</bundles_post_ra>
